<compile_context>
chip_gen: v5e
topology: v5e:2x2
jax: 0.10.0
libtpu: 0.0.40
codegen_flags: <defaults>
</compile_context>

<pallas_src>
import math
import jax
import jax.numpy as jnp
from jax.experimental import pallas as pl
from jax.experimental.pallas import tpu as pltpu


# ----------------------------- PE table ---------------------------------------

def make_pe_table(pos_len: int, d_model: int, dtype=jnp.float32) -> jnp.ndarray:
    """(d_model, pos_len) sin/cos table matching the PyTorch buffer (incl. 0.1 scale)."""
    pos = jnp.arange(pos_len, dtype=jnp.float32)[:, None]                 # (pos_len, 1)
    div_term = jnp.exp(
        jnp.arange(0, d_model, 2, dtype=jnp.float32) * (-math.log(10000.0) / d_model)
    )
    pe = jnp.zeros((pos_len, d_model), dtype=jnp.float32)
    pe = pe.at[:, 0::2].set(0.1 * jnp.sin(pos * div_term))
    # slice div_term so odd d_model also works (PyTorch original errors there)
    pe = pe.at[:, 1::2].set(0.1 * jnp.cos(pos * div_term[: d_model // 2]))
    # torch: unsqueeze(0).transpose(1,2) -> (1, d_model, pos_len); kept squeezed here.
    return pe.T.astype(dtype)                                             # (d_model, pos_len)


# ----------------------------- kernel ------------------------------------------

def _add_pe_kernel(x_ref, pe_ref, o_ref):
    # x_ref/o_ref: (bb, tr, tl); pe_ref: (tr, tl) — broadcast over the batch dim.
    o_ref[...] = x_ref[...] + pe_ref[...][None]


# ----------------------------- tiling helpers ----------------------------------

def _choose_tile(dim: int, target: int, granule: int) -> int:
    """Full extent for small dims, else the largest granule-multiple <= target
    that divides `dim` exactly, falling back to a ragged-edge granule multiple."""
    target = max(granule, target)
    if dim <= target:
        return dim
    top = (target // granule) * granule
    for cand in range(top, granule - 1, -granule):
        if dim % cand == 0:
            return cand
    return top


def _block_budget_bytes() -> int:
    """Per-block byte budget for the x/out tile, per TPU generation, so DMA time
    per grid step dominates the ~0.35 us fixed step overhead while the
    double-buffered footprint stays inside scoped VMEM."""
    try:
        kind = jax.devices()[0].device_kind.lower()
    except Exception:
        kind = ""
    if "v7" in kind:
        return 4 << 20   # 3.2 TB/s HBM: 4 MiB blocks -> overhead < ~10%
    if "v6" in kind:
        return 2 << 20   # ~1.4 TB/s
    return 1 << 20       # v5e & unknown: safe (we also raise vmem_limit_bytes)


def _pe_broadcast_add(x: jnp.ndarray, pe: jnp.ndarray, in_place: bool = False):
    """x: (B, R, L), pe: (R, L)  ->  x + pe[None]   (lane-dense tiled Pallas add)."""
    B, R, L = x.shape
    assert pe.shape == (R, L), (pe.shape, x.shape)
    itemsize = jnp.dtype(x.dtype).itemsize
    sub_granule = {1: 32, 2: 16}.get(itemsize, 8)

    # Re-fold a lane-sparse trailing dim (<128 lanes) into lane-dense rows when
    # row-major flattening allows it (metadata reshape; pe folds identically).
    Rf, Lf = R, L
    if L < 128 and (R * L) % 128 == 0:
        Lf = 128
        while ((R * L) % (Lf * 2) == 0 and Lf * 2 <= 2048
               and (R * L) // (Lf * 2) >= sub_granule):
            Lf *= 2
        Rf = (R * L) // Lf
        x = x.reshape(B, Rf, Lf)
        pe = pe.reshape(Rf, Lf)
    # TODO(synk): when L < 128 and R*L is not 128-divisible we fall through to a
    # lane-sparse (masked-store) block; a wrapper-side jnp.pad would cost more
    # HBM traffic than it saves, so padding would have to be fused in-pipeline.

    budget = _block_budget_bytes()

    # Lane tile: as wide as possible (128-multiple), capped by the budget.
    tl = _choose_tile(Lf, min(2048, max(128, budget // (sub_granule * itemsize))), 128)

    # Fold the batch into the block: largest divisor of B that still leaves room
    # for at least one sub_granule row slab inside the budget.
    bb = 1
    for cand in range(B, 0, -1):
        if B % cand == 0 and cand * sub_granule * tl * itemsize <= budget:
            bb = cand
            break

    row_budget = max(sub_granule, budget // max(1, bb * tl * itemsize))
    tr = _choose_tile(Rf, row_budget, sub_granule)

    grid_b, grid_r, grid_l = B // bb, pl.cdiv(Rf, tr), pl.cdiv(Lf, tl)

    # v7x megacore: expose >= 2 parallel blocks when the whole problem would
    # otherwise be a single block, so both TensorCores get work.
    if grid_b * grid_r * grid_l == 1:
        if bb % 2 == 0:
            bb //= 2; grid_b = 2
        elif tr % (2 * sub_granule) == 0 and Rf % (tr // 2) == 0:
            tr //= 2; grid_r = 2
        elif tl % 256 == 0 and Lf % (tl // 2) == 0:
            tl //= 2; grid_l = 2

    out = pl.pallas_call(
        _add_pe_kernel,
        out_shape=jax.ShapeDtypeStruct((B, Rf, Lf), x.dtype),
        grid_spec=pl.GridSpec(
            grid=(grid_b, grid_r, grid_l),
            in_specs=[
                pl.BlockSpec((bb, tr, tl), lambda b, r, l: (b, r, l)),
                pl.BlockSpec((tr, tl), lambda b, r, l: (r, l)),   # PE tracks the tile
            ],
            out_specs=pl.BlockSpec((bb, tr, tl), lambda b, r, l: (b, r, l)),
        ),
        compiler_params=pltpu.CompilerParams(
            dimension_semantics=("parallel", "parallel", "parallel"),
            vmem_limit_bytes=32 << 20),
        input_output_aliases=({0: 0} if in_place else {}),
    )(x, pe)

    if (Rf, Lf) != (R, L):
        out = out.reshape(B, R, L)
    return out


# ----------------------------- module wrapper ------------------------------------

class PositionalEncoding:
    """JAX/Pallas port of models/model_utils.PositionalEncoding (forward, p=0 path).

    The expanded, lane-dense PE used by the kernel is a model constant: built
    lazily once per (pe_type, shape, dtype) and cached, so repeated calls add
    zero extra HBM traffic for the expansion / dtype cast.
    """

    def __init__(self, pos_len, d_model=512, pe_type='t', dropout=0.0):
        # TODO(synk): dropout p>0 (training-time RNG mask) is not implemented; it
        # would use pltpu.prng_seed + pltpu.prng_random_bits inside the kernel.
        self.pe_type = pe_type
        self.dropout_p = dropout
        self.pe = make_pe_table(pos_len, d_model)        # (d_model, pos_len) f32 buffer
        self._cache = {}

    def _cached(self, key, build):
        if key not in self._cache:
            self._cache[key] = build()
        return self._cache[key]

    def __call__(self, x: jnp.ndarray, in_place: bool = False) -> jnp.ndarray:
        dt = x.dtype
        if x.ndim == 4:
            B, C, T, F = x.shape
            if self.pe_type == 't':
                pe = self._cached(
                    ('t4', T, F, str(dt)),
                    lambda: jnp.repeat(self.pe[:, :T].astype(dt), F, axis=1))  # (C, T*F)
            elif self.pe_type == 'f':
                pe = self._cached(
                    ('f4', T, F, str(dt)),
                    lambda: jnp.tile(self.pe[:, :F].astype(dt), (1, T)))       # (C, T*F)
            else:
                return x   # matches torch: unknown pe_type on 4-D falls through (no add)
            y = _pe_broadcast_add(x.reshape(B, C, T * F), pe, in_place)
            return y.reshape(B, C, T, F)
        if x.ndim == 3:
            B, C, T = x.shape
            pe = self._cached(('3', T, str(dt)), lambda: self.pe[:, :T].astype(dt))
            return _pe_broadcast_add(x, pe, in_place)
        return x


# ----------------------------- reference & main ----------------------------------

def positional_encoding_ref(x, pe_table, pe_type='t'):
    pe_table = pe_table.astype(x.dtype)
    if x.ndim == 4:
        if pe_type == 't':
            return x + pe_table[None, :, :x.shape[2], None]
        elif pe_type == 'f':
            return x + pe_table[None, :, None, :x.shape[3]]
        return x
    elif x.ndim == 3:
        return x + pe_table[None, :, :x.shape[2]]
    return x


if __name__ == "__main__":
    key = jax.random.PRNGKey(0)
    B, C, T, F = 2, 32, 16, 16           # C = d_model
    pos_len = 64

    enc_t = PositionalEncoding(pos_len, d_model=C, pe_type='t')
    enc_f = PositionalEncoding(pos_len, d_model=C, pe_type='f')
    pe_table = enc_t.pe                  # (C, pos_len) buffer, for the reference

    k1, k2 = jax.random.split(key)
    x4 = jax.random.normal(k1, (B, C, T, F), dtype=jnp.float32)
    x3 = jax.random.normal(k2, (B, C, T), dtype=jnp.float32)

    # 4-D input, pe_type 't' (called twice: second call reuses the cached PE)
    ref_t = positional_encoding_ref(x4, pe_table, pe_type='t')
    out_t = jax.block_until_ready(enc_t(x4))
    out_t = jax.block_until_ready(enc_t(x4))
    assert jnp.allclose(out_t, ref_t, atol=1e-6, rtol=1e-6)

    # 4-D input, pe_type 'f'
    ref_f = positional_encoding_ref(x4, pe_table, pe_type='f')
    out_f = jax.block_until_ready(enc_f(x4))
    assert jnp.allclose(out_f, ref_f, atol=1e-6, rtol=1e-6)

    # 3-D input (T < 128 -> lane-dense re-fold path)
    ref_3 = positional_encoding_ref(x3, pe_table, pe_type='t')
    out_3 = jax.block_until_ready(enc_t(x3))
    assert jnp.allclose(out_3, ref_3, atol=1e-6, rtol=1e-6)

    # bf16 input (dtype-aware sublane granule; cached bf16 PE)
    x4_bf = x4.astype(jnp.bfloat16)
    ref_b = positional_encoding_ref(x4_bf, pe_table, pe_type='t')
    out_b = jax.block_until_ready(enc_t(x4_bf))
    assert jnp.allclose(out_b.astype(jnp.float32), ref_b.astype(jnp.float32),
                        atol=2e-2, rtol=2e-2)

    # in-place variant: output HBM buffer aliases the (donated) input buffer
    f_inplace = jax.jit(lambda a: enc_t(a, in_place=True), donate_argnums=0)
    out_ip = jax.block_until_ready(f_inplace(x4 * 1.0))
    assert jnp.allclose(out_ip, ref_t, atol=1e-6, rtol=1e-6)

    print("KERNEL_OK")
</pallas_src>

<mosaic_0001>
module attributes {stable_mosaic.version = 11 : i64} {
  func.func @_add_pe_kernel(%arg0: i32, %arg1: i32, %arg2: i32, %arg3: memref<1x32x256xf32, #tpu.memory_space<vmem>>, %arg4: memref<32x256xf32, #tpu.memory_space<vmem>>, %arg5: memref<1x32x256xf32, #tpu.memory_space<vmem>>) attributes {dimension_semantics = [#tpu.dimension_semantics<parallel>, #tpu.dimension_semantics<parallel>, #tpu.dimension_semantics<parallel>], iteration_bounds = array<i64: 2, 1, 1>, scalar_prefetch = 0 : i64, scratch_operands = 0 : i64, tpu.core_type = #tpu.core_type<tc>, window_params = [{transform_indices = @transform_0, window_bounds = array<i64: 1, 32, 256>}, {transform_indices = @transform_1, window_bounds = array<i64: 32, 256>}, {transform_indices = @transform_2, window_bounds = array<i64: 1, 32, 256>}]} {
    %c0 = arith.constant 0 : index
    %c0_0 = arith.constant 0 : index
    %c0_1 = arith.constant 0 : index
    %0 = vector.load %arg3[%c0, %c0_0, %c0_1] : memref<1x32x256xf32, #tpu.memory_space<vmem>>, vector<1x32x256xf32>
    %c0_2 = arith.constant 0 : index
    %c0_3 = arith.constant 0 : index
    %1 = vector.load %arg4[%c0_2, %c0_3] : memref<32x256xf32, #tpu.memory_space<vmem>>, vector<32x256xf32>
    %2 = vector.shape_cast %1 : vector<32x256xf32> to vector<1x32x256xf32>
    %3 = arith.addf %0, %2 : vector<1x32x256xf32>
    %c0_4 = arith.constant 0 : index
    %c0_5 = arith.constant 0 : index
    %c0_6 = arith.constant 0 : index
    %4 = vector.load %arg5[%c0_4, %c0_5, %c0_6] : memref<1x32x256xf32, #tpu.memory_space<vmem>>, vector<1x32x256xf32>
    tpu.vector_store %arg5[%c0_4, %c0_5, %c0_6], %3 {strides = array<i32>} : memref<1x32x256xf32, #tpu.memory_space<vmem>>, vector<1x32x256xf32>,
    return
  }
  func.func @transform_0(%arg0: i32, %arg1: i32, %arg2: i32) -> (i32, i32, i32) {
    %c0_i32 = arith.constant 0 : i32
    return %arg0, %arg1, %arg2 : i32, i32, i32
  }
  func.func @transform_1(%arg0: i32, %arg1: i32, %arg2: i32) -> (i32, i32) {
    %c0_i32 = arith.constant 0 : i32
    return %arg1, %arg2 : i32, i32
  }
  func.func @transform_2(%arg0: i32, %arg1: i32, %arg2: i32) -> (i32, i32, i32) {
    %c0_i32 = arith.constant 0 : i32
    return %arg0, %arg1, %arg2 : i32, i32, i32
  }
}

</mosaic_0001>

<bundles_post_ra>
// kernel: tpu_custom_call.1
= control target key start
LH: loop header
LB: loop body
LE: loop exit
PB: predicated region body
PF: predicated region fallthrough
CT: control target
= control target key end

     0   :  { %7 = vsyncpa [#allocation3], 0  ;;  %s823_s0 = inlined_call_operand.hbm [shape: f32[2,32,256], index: 0, kind: input, shape index: {}]   ;;  %s824_s1 = inlined_call_operand.hbm [shape: f32[32,256], index: 1, kind: input, shape index: {}]   ;;  %s825_s2 = inlined_call_operand.hbm [shape: f32[2,32,256], index: 2, kind: output, shape index: {}]  }
   0x1   :  { %9 = vsyncpa [#allocation3 + $0x1], 0 }
   0x2   :  { %10 = vsyncpa [#allocation6], 0 }
   0x3   :  { %11 = vsyncpa [#allocation4], 0 }
   0x4   :  { %13 = vsyncpa [#allocation4 + $0x1], 0  ;;  %s658_s9 = smov 0   ;;  %s660_s10 = smov 0  }
   0x5   :  { %s662_s11 = smov 0   ;;  %s664_s12 = smov 0  }
   0x6   :  { %s666_s13 = smov 0   ;;  %s668_s14 = smov 0  }
   0x7 LB: > { %s394_s15 = sadd.s32 4294967295, %s636_s14   ;;  %s395_s16 = sadd.s32 4294967294, %s636_s14   ;;  %s636_s14 = sphi %s668_s14, %s19_s14   ;;  %s632_s13 = sphi %s666_s13, %s837_s13   ;;  %s628_s12 = sphi %s664_s12, %s836_s12   ;;  %s624_s11 = sphi %s662_s11, %s835_s11   ;;  %s620_s10 = sphi %s660_s10, %s834_s10   ;;  %s616_s9 = sphi %s658_s9, %s833_s9  }
   0x8   : > { %p62_p0 = scmp.ne.s32.totalorder %s620_s10, %s616_s9  ;;  %p692_p1 = scmp.eq.s32.totalorder %s394_s15, 0 }
   0x9   : > { %p696_p2 = scmp.eq.s32.totalorder %s394_s15, 1  ;;  %p124_p3 = scmp.eq.s32.totalorder %s395_s16, 1 }
   0xa   : > { %p702_p4 = por %p692_p1, %p62_p0  ;;  %p396_p5 = scmp.ge.s32.totalorder %s636_s14, 1 }
   0xb   : > { %p707_p6 = por %p124_p3, %p62_p0  ;;  %p131_p7 = scmp.lt.s32.totalorder %s636_s14, 3 }
   0xc   : > { %s148_s23 = sshll.u32 %s824_s1, 4  ;;  %s638_s25 = smov [#allocation5]   ;;  %s149_s23 = int_to_ptr.hbm [resolvable:$true] %s148_s23 }
   0xd   : > { %p715_p8 = pnand %p396_p5, %p131_p7  ;;  %s150_s26 = sshll.u32 %s638_s25, 4  ;;  %s151_s26 = int_to_ptr.vmem [resolvable:$true] %s150_s26 }
   0xe   : > { %p398_p11 = scmp.ge.s32.totalorder %s636_s14, 2  ;;  %s639_s27 = smov 256  }
   0xf   : > { %p421_p9 = pneg %p715_p8  ;;  %s640_s28 = smov 16  }
  0x10   : > { %s38_s29 = sadd.s32 1, %s632_s13  ;;  %s49_s30 = sadd.s32 1, %s624_s11 }
  0x11   : > { %p422_p10 = pnand %p421_p9, %p692_p1  ;;  %p40_p12 = scmp.ge.s32.totalorder %s38_s29, 2 }
  0x12   : > { %p56_p13 = scmp.ne.s32.totalorder %s624_s11, %s620_s10  ;;  %p57_p0 = scmp.eq.s32.totalorder %s636_s14, 0 }
  0x13   : > { %424 = dma.hbm_to_vmem [thread:$0]  (!%p422_p10), %s149_s23, 1024, %s151_s26, [#allocation6], %s639_s27, %s639_s27, %s640_s28  }
  0x14   : > { %s839_s29 = smov (%p40_p12, %s38_s29), 0  ;;  %p734_p3 = por %p57_p0, %p56_p13 }
  0x15   : > { %p740_p5 = por %p696_p2, %p56_p13  ;;  %s42_s5 = ssub.s32 %s632_s13, %s839_s29 }
  0x16   : > { %p434_p7 = scmp.lt.s32.totalorder %s636_s14, 2  ;;  %p47_p9 = scmp.eq.s32.totalorder %s42_s5, 0 }
  0x17   : > { %s164_s6 = sand.u32 1, %s624_s11   ;;  %s411_s15 = sshll.u32 %s632_s13, 6 }
  0x18   : > { %s399_s7 = sshll.u32 %s164_s6, 6  ;;  %s178_s22 = scalar_lea.hbm %s823_s0, %s411_s15 }
  0x19   : > { %s749_s8 = scalar_select %p47_p9, %s624_s11, %s49_s30  }
  0x1a   : > { %s168_s23 = scalar_lea.vmem [#allocation2], %s399_s7  ;;  %s179_s18 = sshll.u32 %s178_s22, 4  ;;  %s180_s18 = int_to_ptr.hbm [resolvable:$true] %s179_s18 }
  0x1b   : > { %s181_s25 = sshll.u32 %s168_s23, 4  ;;  %p426_p2 = pnand %p434_p7, %p734_p3  ;;  %s182_s25 = int_to_ptr.vmem [resolvable:$true] %s181_s25 }
  0x1c   : > { %s165_s26 = scalar_lea.sflag [#allocation3], %s164_s6  ;;  %193 = sbr.rel (%p715_p8) target bundleno = 52 (0x34), region = 28 }
  0x1d   : > { %428 = dma.hbm_to_vmem [thread:$0]  (!%p426_p2), %s180_s18, 1024, %s182_s25, %s165_s26, %s639_s27, %s639_s27, %s640_s28  }
  0x1e   : > { %s763_s30 = sand.u32 (!%p715_p8), 1, %s620_s10  }
  0x1f   : > { %s403_s5 = sshll.u32 (!%p715_p8), %s763_s30, 6  ;;  %s196_s7 = scalar_lea.sflag (!%p715_p8), [#allocation3], %s763_s30 }
  0x20   : > { %s767_s15 = scalar_lea.vmem (!%p715_p8), [#allocation2], %s403_s5 }
  0x21   : > { %603 = dma.done.wait (%p702_p4), %s196_s7, 1024  }
  0x22   : > { %605 = vsyncadd (%p702_p4), %s196_s7, 4294966272 }
  0x23   : > { %607 = dma.done.wait (%p692_p1), [#allocation6], 1024  }
  0x24   : > { %609 = vsyncadd (%p692_p1), [#allocation6], 4294966272  ;;  %s412_s24 = sshll.u32 %s628_s12, 6  ;;  %v232_v0 = vld [vmem:[%s767_s15] sm:$0xff]  ;;  %v233_v2 = vld [vmem:[%s767_s15 + $0x8] sm:$0xff]  ;;  %s225_s12 = scalar_lea.vmem [#allocation7], %s403_s5 }
  0x25   : > { %v240_v1 = vld [vmem:[#allocation5] sm:$0xff]  ;;  %v241_v4 = vld [vmem:[#allocation5 + $0x8] sm:$0xff]  ;;  %v234_v5 = vld [vmem:[%s767_s15 + $0x10] sm:$0xff]  ;;  %s281_s27 = scalar_lea.hbm %s825_s2, %s412_s24  ;;  %s282_s28 = sshll.u32 %s225_s12, 4  ;;  %s283_s28 = int_to_ptr.vmem [resolvable:$true] %s282_s28 }
  0x26   : > { %v248_v3 = vadd.f32 %v240_v1, %v232_v0  ;;  %v242_v6 = vld [vmem:[#allocation5 + $0x10] sm:$0xff]  ;;  %v249_v7 = vadd.f32 %v241_v4, %v233_v2  ;;  %v235_v9 = vld [vmem:[%s767_s15 + $0x18] sm:$0xff]  ;;  %v236_v11 = vld [vmem:[%s767_s15 + $0x20] sm:$0xff]  ;;  %s284_s3 = sshll.u32 %s281_s27, 4  ;;  %s265_s6 = scalar_lea.sflag [#allocation4], %s763_s30  ;;  %s285_s3 = int_to_ptr.hbm [resolvable:$true] %s284_s3 }
  0x27   : > { %v250_v8 = vadd.f32 %v242_v6, %v234_v5  ;;  %v243_v10 = vld [vmem:[#allocation5 + $0x18] sm:$0xff]  ;;  %v244_v13 = vld [vmem:[#allocation5 + $0x20] sm:$0xff]  ;;  %v237_v14 = vld [vmem:[%s767_s15 + $0x28] sm:$0xff]  ;;  %s564_s16 = sshra.s32 %s285_s3, 4  ;;  %s570_s25 = scalar_lea.hbm %s825_s2, 128  ;;  %s565_s16 = int_to_ptr.hbm [resolvable:$true] %s564_s16 }
  0x28   : > { %256 = vst [vmem:[%s225_s12] sm:$0xff] %v248_v3  ;;  %v251_v12 = vadd.f32 %v243_v10, %v235_v9  ;;  %v245_v15 = vld [vmem:[#allocation5 + $0x28] sm:$0xff]  ;;  %v252_v16 = vadd.f32 %v244_v13, %v236_v11  ;;  %v238_v18 = vld [vmem:[%s767_s15 + $0x30] sm:$0xff]  ;;  %v239_v20 = vld [vmem:[%s767_s15 + $0x38] sm:$0xff]  ;;  %s566_s21 = scalar_lea.hbm %s565_s16, 64  ;;  %p571_p10 = scmp.lt.s32.totalorder %s565_s16, %s825_s2 }
  0x29   : > { %257 = vst [vmem:[%s225_s12 + $0x8] sm:$0xff] %v249_v7  ;;  %v253_v17 = vadd.f32 %v245_v15, %v237_v14  ;;  %v246_v19 = vld [vmem:[#allocation5 + $0x30] sm:$0xff]  ;;  %v247_v22 = vld [vmem:[#allocation5 + $0x38] sm:$0xff]  ;;  %p567_p1 = scmp.ne.s32.totalorder %s565_s16, %s566_s21  ;;  %p572_p12 = scmp.lt.s32.totalorder %s570_s25, %s566_s21 }
  0x2a   : > { %258 = vst [vmem:[%s225_s12 + $0x10] sm:$0xff] %v250_v8  ;;  %v254_v21 = vadd.f32 %v246_v19, %v238_v18  ;;  %v255_v23 = vadd.f32 %v247_v22, %v239_v20 }
  0x2b   : > { %259 = vst [vmem:[%s225_s12 + $0x18] sm:$0xff] %v251_v12  ;;  %p568_p4 = pnand %p567_p1, %p740_p5  ;;  %p573_p13 = por %p572_p12, %p571_p10 }
  0x2c   : > { %260 = vst [vmem:[%s225_s12 + $0x20] sm:$0xff] %v252_v16 }
  0x2d   : > { %261 = vst [vmem:[%s225_s12 + $0x28] sm:$0xff] %v253_v17  ;;  %p569_p8 = pneg %p568_p4 }
  0x2e   : > { %262 = vst [vmem:[%s225_s12 + $0x30] sm:$0xff] %v254_v21 }
  0x2f   : > { %263 = vst [vmem:[%s225_s12 + $0x38] sm:$0xff] %v255_v23  ;;  %p574_p0 = pnand %p573_p13, %p569_p8 }
  0x31   : > { %577 = shalt.err (!%p574_p0)
}
  0x32   : > { %s641_s30 = smov 256   ;;  %s642_s5 = smov 16  }
  0x33   : > { %419 = dma.vmem_to_hbm [thread:$0]  (%p740_p5), %s283_s28, 1024, %s285_s3, %s265_s6, %s641_s30, %s641_s30, %s642_s5  }
  0x34 PF: > { %s299_s7 = sand.u32 1, %s616_s9   ;;  %p430_p3 = pnand %p398_p11, %p707_p6 }
  0x35   : > { %s300_s15 = scalar_lea.sflag [#allocation4], %s299_s7 }
  0x36   : > { %p431_p7 = pneg %p430_p3 }
  0x38   : > { %611 = dma.done.wait (%p431_p7), %s300_s15, 1024  }
  0x39   : > { %613 = vsyncadd (%p431_p7), %s300_s15, 4294966272  ;;  %s19_s14 = sadd.s32 1, %s636_s14   ;;  %s833_s9 = smov %s620_s10 }
  0x3a   : > { %p16_p9 = scmp.ge.s32.totalorder %s19_s14, 4   ;;  %s834_s10 = smov %s624_s11 }
  0x3b   : > { %s835_s11 = smov %s749_s8  ;;  %s836_s12 = smov %s632_s13 }
  0x3c   : > { %s837_s13 = smov %s839_s29  ;;  %18 = sbr.rel (!%p16_p9) target bundleno = 7 (0x7), region = 78 }
  0x41   :  { %306 = vsyncpa [#allocation3], 1 }
  0x42   :  { %308 = vsyncpa [#allocation3 + $0x1], 1 }
  0x43   :  { %309 = vsyncpa [#allocation6], 1 }
  0x44   :  { %310 = vsyncpa [#allocation4], 1 }
  0x45   :  { %312 = vsyncpa [#allocation4 + $0x1], 1 }

</bundles_post_ra>
